<compile_context>
chip_gen: v7x
topology: tpu7x:2x2x1
jax: 0.10.0
libtpu: 0.0.40
codegen_flags: <defaults>
</compile_context>

<pallas_src>
import jax
import jax.numpy as jnp
from jax.experimental import pallas as pl
from jax.experimental.pallas import tpu as pltpu


_GROUP = 8      # per-sample mask-group rows, padded to the f32 sublane tile (8)
_OUT_PAD = 128  # lane-dense padded width of the fused output projection
_HID = 128      # padded hidden width (the 64-wide layer is zero-padded to 128)


def _leaky_relu(x, slope=0.2):
    # nn.LeakyReLU(0.2) in the reference module.
    return jnp.where(x > 0, x, slope * x)


def _resident(shape):
    # Full-array block with a constant index_map: loaded once, stays resident.
    nd = len(shape)
    return pl.BlockSpec(tuple(shape), lambda n, _nd=nd: (0,) * _nd)


def make_generator_kernel(n_masks):
    def kernel(feat_ref, img_ref, w1, b1, w2, b2, w3, b3, w45, b45, out_ref):
        bt = img_ref.shape[0]  # samples in this batch tile (static)

        # ---------------- MLP on the bt * _GROUP rows of this tile ----------------
        x = feat_ref[...]                                             # (bt*8, z_dim)
        h = _leaky_relu(jnp.dot(x, w1[...], preferred_element_type=jnp.float32) + b1[...])
        h = _leaky_relu(jnp.dot(h, w2[...], preferred_element_type=jnp.float32) + b2[...])
        h = _leaky_relu(jnp.dot(h, w3[...], preferred_element_type=jnp.float32) + b3[...])
        # Fused Linear(128, z_dim) . Linear(z_dim, 3), zero-padded to 128 lanes:
        # only columns [:3] are meaningful.
        rgb = jnp.tanh(
            jnp.dot(h, w45[...], preferred_element_type=jnp.float32) + b45[...])
        # (bt*8, 128) -> (bt, 8, 128): layout-preserving split (group == sublane tile).
        rgb = rgb.reshape(bt, _GROUP, _OUT_PAD)
        # (bt, 8, 128) -> (bt, 128, 8): per-sample native (8,128) tile transpose so
        # channels land on sublanes and the mask index lands on lanes.
        rgb = jnp.transpose(rgb, (0, 2, 1))

        # -------- alpha compositing, vectorized over (bt, 3 channels, HW) ---------
        bg = img_ref[:, n_masks:, :]                                  # (bt, 3, HW)
        for i in range(n_masks):
            m = img_ref[:, i:i + 1, :]                                # (bt, 1, HW)
            r = rgb[:, 0:3, i:i + 1]                                  # (bt, 3, 1)
            bg = bg + m * (r - bg)                                    # == m*r + (1-m)*bg
        out_ref[...] = bg

    return kernel


def _pick_batch_tile(n, c, hw, budget_bytes=20 * 1024 * 1024):
    # Double-buffered image block (c channels) + output block (3 channels), f32.
    per_sample = (c + 3) * hw * 4 * 2
    cap = max(1, budget_bytes // per_sample)
    # Keep >= 2 grid steps whenever N > 1: with dimension_semantics=("parallel",)
    # a multi-step grid shards across v7x's two TensorCores.
    two_step = max(1, (n + 1) // 2)
    return max(1, min(cap, two_step))


def generator_forward(features, x_img, params, n_masks, imsize):
    N, _, z_dim = features.shape
    C = n_masks + 3
    HW = imsize * imsize
    w1, b1, w2, b2, w3, b3, w4, b4, w5, b5 = params

    # ---- exact host-side weight prep (tiny tensors, constant-folded under jit) ----
    h1 = w1.shape[1]  # 64
    w1p = jnp.zeros((z_dim, _HID), jnp.float32).at[:, :h1].set(w1)
    b1p = jnp.zeros((1, _HID), jnp.float32).at[:, :h1].set(b1)
    w2p = jnp.zeros((_HID, _HID), jnp.float32).at[:h1, :].set(w2)   # pad rows -> exact
    w45 = w4 @ w5                         # (128, 3)  -- no activation between 4 and 5
    b45 = b4 @ w5 + b5                    # (1, 3)
    w45p = jnp.zeros((_HID, _OUT_PAD), jnp.float32).at[:, :3].set(w45)
    b45p = jnp.zeros((1, _OUT_PAD), jnp.float32).at[:, :3].set(b45)

    # Pad per-sample mask groups n_masks -> 8 rows (zeros; pad rows never read back).
    feats = jnp.zeros((N, _GROUP, z_dim), jnp.float32).at[:, :n_masks, :].set(features)
    feats = feats.reshape(N * _GROUP, z_dim)

    # Flatten spatial so H*W is the lane axis (dense when imsize % 16 == 0).
    img = x_img.reshape(N, C, HW)

    Bt = _pick_batch_tile(N, C, HW)
    grid = (pl.cdiv(N, Bt),)

    out = pl.pallas_call(
        make_generator_kernel(n_masks),
        out_shape=jax.ShapeDtypeStruct((N, 3, HW), jnp.float32),
        grid=grid,
        in_specs=[
            pl.BlockSpec((Bt * _GROUP, z_dim), lambda n: (n, 0)),
            pl.BlockSpec((Bt, C, HW), lambda n: (n, 0, 0)),
            _resident(w1p.shape), _resident(b1p.shape),
            _resident(w2p.shape), _resident(b2.shape),
            _resident(w3.shape), _resident(b3.shape),
            _resident(w45p.shape), _resident(b45p.shape),
        ],
        out_specs=pl.BlockSpec((Bt, 3, HW), lambda n: (n, 0, 0)),
        compiler_params=pltpu.CompilerParams(
            dimension_semantics=("parallel",),
            vmem_limit_bytes=40 * 1024 * 1024,
        ),
    )(feats, img, w1p, b1p, w2p, b2, w3, b3, w45p, b45p)

    return out.reshape(N, 3, imsize, imsize)


def reference_forward(features, x_img, params, n_masks, imsize):
    """Pure-JAX reference mirroring the PyTorch forward exactly (unfused)."""
    N, _, z_dim = features.shape
    w1, b1, w2, b2, w3, b3, w4, b4, w5, b5 = params
    x = features.reshape(-1, z_dim)
    h = _leaky_relu(x @ w1 + b1)
    h = _leaky_relu(h @ w2 + b2)
    h = _leaky_relu(h @ w3 + b3)
    h = h @ w4 + b4
    h = jnp.tanh(h @ w5 + b5)
    rgb = h.reshape(N, n_masks, 3, 1, 1)
    bg = x_img[:, -3:, :, :]
    ones = jnp.ones((N, 1, imsize, imsize), jnp.float32)
    for i in range(n_masks):
        layer = rgb[:, i, :, :, :] * ones
        mask = x_img[:, i:i + 1, :, :]
        bg = mask * layer + (1.0 - mask) * bg
    return bg


if __name__ == "__main__":
    N, n_masks, z_dim, imsize = 2, 4, 8, 16

    key = jax.random.PRNGKey(0)
    keys = jax.random.split(key, 12)

    def init(k, shape):
        return (0.1 * jax.random.normal(k, shape, jnp.float32)).astype(jnp.float32)

    # Linear weights stored as (in, out) = torch_weight.T; biases as (1, out).
    layer_dims = [(z_dim, 64), (64, 128), (128, 128), (128, z_dim), (z_dim, 3)]
    params = []
    for li, (din, dout) in enumerate(layer_dims):
        params.append(init(keys[2 * li], (din, dout)))
        params.append(init(keys[2 * li + 1], (1, dout)))
    params = tuple(params)

    features = jax.random.normal(keys[10], (N, n_masks, z_dim), jnp.float32)
    raw = jax.random.normal(keys[11], (N, n_masks + 3, imsize, imsize), jnp.float32)
    # First n_masks channels are soft masks in [0, 1]; last 3 are the background RGB.
    x_img = jnp.concatenate(
        [jax.nn.sigmoid(raw[:, :n_masks]), raw[:, n_masks:]], axis=1
    ).astype(jnp.float32)

    fwd = jax.jit(lambda f, x, p: generator_forward(f, x, p, n_masks, imsize))
    out = jax.block_until_ready(fwd(features, x_img, params))

    ref = reference_forward(features, x_img, params, n_masks, imsize)
    assert out.shape == (N, 3, imsize, imsize)
    err = float(jnp.max(jnp.abs(out - ref)))
    assert jnp.allclose(out, ref, atol=1e-5, rtol=1e-5), err

    print("KERNEL_OK")
</pallas_src>

<mosaic_0001>
module attributes {stable_mosaic.version = 11 : i64} {
  func.func @kernel(%arg0: i32, %arg1: memref<8x8xf32, #tpu.memory_space<vmem>>, %arg2: memref<1x7x256xf32, #tpu.memory_space<vmem>>, %arg3: memref<8x128xf32, #tpu.memory_space<vmem>>, %arg4: memref<1x128xf32, #tpu.memory_space<vmem>>, %arg5: memref<128x128xf32, #tpu.memory_space<vmem>>, %arg6: memref<1x128xf32, #tpu.memory_space<vmem>>, %arg7: memref<128x128xf32, #tpu.memory_space<vmem>>, %arg8: memref<1x128xf32, #tpu.memory_space<vmem>>, %arg9: memref<128x128xf32, #tpu.memory_space<vmem>>, %arg10: memref<1x128xf32, #tpu.memory_space<vmem>>, %arg11: memref<1x3x256xf32, #tpu.memory_space<vmem>>) attributes {dimension_semantics = [#tpu.dimension_semantics<parallel>], iteration_bounds = array<i64: 2>, scalar_prefetch = 0 : i64, scratch_operands = 0 : i64, tpu.core_type = #tpu.core_type<tc>, window_params = [{transform_indices = @transform_0, window_bounds = array<i64: 8, 8>}, {transform_indices = @transform_1, window_bounds = array<i64: 1, 7, 256>}, {pipeline_mode = #tpu.pipeline_mode<synchronous>, transform_indices = @transform_2, window_bounds = array<i64: 8, 128>}, {pipeline_mode = #tpu.pipeline_mode<synchronous>, transform_indices = @transform_3, window_bounds = array<i64: 1, 128>}, {pipeline_mode = #tpu.pipeline_mode<synchronous>, transform_indices = @transform_4, window_bounds = array<i64: 128, 128>}, {pipeline_mode = #tpu.pipeline_mode<synchronous>, transform_indices = @transform_5, window_bounds = array<i64: 1, 128>}, {pipeline_mode = #tpu.pipeline_mode<synchronous>, transform_indices = @transform_6, window_bounds = array<i64: 128, 128>}, {pipeline_mode = #tpu.pipeline_mode<synchronous>, transform_indices = @transform_7, window_bounds = array<i64: 1, 128>}, {pipeline_mode = #tpu.pipeline_mode<synchronous>, transform_indices = @transform_8, window_bounds = array<i64: 128, 128>}, {pipeline_mode = #tpu.pipeline_mode<synchronous>, transform_indices = @transform_9, window_bounds = array<i64: 1, 128>}, {transform_indices = @transform_10, window_bounds = array<i64: 1, 3, 256>}]} {
    %c0 = arith.constant 0 : index
    %c0_0 = arith.constant 0 : index
    %0 = vector.load %arg1[%c0, %c0_0] : memref<8x8xf32, #tpu.memory_space<vmem>>, vector<8x8xf32>
    %c0_1 = arith.constant 0 : index
    %c0_2 = arith.constant 0 : index
    %1 = vector.load %arg3[%c0_1, %c0_2] : memref<8x128xf32, #tpu.memory_space<vmem>>, vector<8x128xf32>
    %cst = arith.constant dense<0.000000e+00> : vector<8x128xf32>
    %2 = tpu.matmul %0, %1, %cst {dimension_numbers = #tpu.dot_dimension_numbers<[1], [0], [0], [1], [0, 0, 1, 1], [], []>} : vector<8x8xf32>, vector<8x128xf32>, vector<8x128xf32> -> vector<8x128xf32>
    %c0_3 = arith.constant 0 : index
    %c0_4 = arith.constant 0 : index
    %3 = vector.load %arg4[%c0_3, %c0_4] : memref<1x128xf32, #tpu.memory_space<vmem>>, vector<1x128xf32>
    %4 = vector.broadcast %3 : vector<1x128xf32> to vector<8x128xf32>
    %5 = arith.addf %2, %4 : vector<8x128xf32>
    %cst_5 = arith.constant 0.000000e+00 : f32
    %6 = vector.broadcast %cst_5 : f32 to vector<8x128xf32>
    %7 = arith.cmpf ogt, %5, %6 : vector<8x128xf32>
    %cst_6 = arith.constant 2.000000e-01 : f32
    %8 = vector.broadcast %cst_6 : f32 to vector<8x128xf32>
    %9 = arith.mulf %8, %5 : vector<8x128xf32>
    %10 = arith.select %7, %5, %9 : vector<8x128xi1>, vector<8x128xf32>
    %c0_7 = arith.constant 0 : index
    %c0_8 = arith.constant 0 : index
    %11 = vector.load %arg5[%c0_7, %c0_8] : memref<128x128xf32, #tpu.memory_space<vmem>>, vector<128x128xf32>
    %cst_9 = arith.constant dense<0.000000e+00> : vector<8x128xf32>
    %12 = tpu.matmul %10, %11, %cst_9 {dimension_numbers = #tpu.dot_dimension_numbers<[1], [0], [0], [1], [0, 0, 1, 1], [], []>} : vector<8x128xf32>, vector<128x128xf32>, vector<8x128xf32> -> vector<8x128xf32>
    %c0_10 = arith.constant 0 : index
    %c0_11 = arith.constant 0 : index
    %13 = vector.load %arg6[%c0_10, %c0_11] : memref<1x128xf32, #tpu.memory_space<vmem>>, vector<1x128xf32>
    %14 = vector.broadcast %13 : vector<1x128xf32> to vector<8x128xf32>
    %15 = arith.addf %12, %14 : vector<8x128xf32>
    %cst_12 = arith.constant 0.000000e+00 : f32
    %16 = vector.broadcast %cst_12 : f32 to vector<8x128xf32>
    %17 = arith.cmpf ogt, %15, %16 : vector<8x128xf32>
    %cst_13 = arith.constant 2.000000e-01 : f32
    %18 = vector.broadcast %cst_13 : f32 to vector<8x128xf32>
    %19 = arith.mulf %18, %15 : vector<8x128xf32>
    %20 = arith.select %17, %15, %19 : vector<8x128xi1>, vector<8x128xf32>
    %c0_14 = arith.constant 0 : index
    %c0_15 = arith.constant 0 : index
    %21 = vector.load %arg7[%c0_14, %c0_15] : memref<128x128xf32, #tpu.memory_space<vmem>>, vector<128x128xf32>
    %cst_16 = arith.constant dense<0.000000e+00> : vector<8x128xf32>
    %22 = tpu.matmul %20, %21, %cst_16 {dimension_numbers = #tpu.dot_dimension_numbers<[1], [0], [0], [1], [0, 0, 1, 1], [], []>} : vector<8x128xf32>, vector<128x128xf32>, vector<8x128xf32> -> vector<8x128xf32>
    %c0_17 = arith.constant 0 : index
    %c0_18 = arith.constant 0 : index
    %23 = vector.load %arg8[%c0_17, %c0_18] : memref<1x128xf32, #tpu.memory_space<vmem>>, vector<1x128xf32>
    %24 = vector.broadcast %23 : vector<1x128xf32> to vector<8x128xf32>
    %25 = arith.addf %22, %24 : vector<8x128xf32>
    %cst_19 = arith.constant 0.000000e+00 : f32
    %26 = vector.broadcast %cst_19 : f32 to vector<8x128xf32>
    %27 = arith.cmpf ogt, %25, %26 : vector<8x128xf32>
    %cst_20 = arith.constant 2.000000e-01 : f32
    %28 = vector.broadcast %cst_20 : f32 to vector<8x128xf32>
    %29 = arith.mulf %28, %25 : vector<8x128xf32>
    %30 = arith.select %27, %25, %29 : vector<8x128xi1>, vector<8x128xf32>
    %c0_21 = arith.constant 0 : index
    %c0_22 = arith.constant 0 : index
    %31 = vector.load %arg9[%c0_21, %c0_22] : memref<128x128xf32, #tpu.memory_space<vmem>>, vector<128x128xf32>
    %cst_23 = arith.constant dense<0.000000e+00> : vector<8x128xf32>
    %32 = tpu.matmul %30, %31, %cst_23 {dimension_numbers = #tpu.dot_dimension_numbers<[1], [0], [0], [1], [0, 0, 1, 1], [], []>} : vector<8x128xf32>, vector<128x128xf32>, vector<8x128xf32> -> vector<8x128xf32>
    %c0_24 = arith.constant 0 : index
    %c0_25 = arith.constant 0 : index
    %33 = vector.load %arg10[%c0_24, %c0_25] : memref<1x128xf32, #tpu.memory_space<vmem>>, vector<1x128xf32>
    %34 = vector.broadcast %33 : vector<1x128xf32> to vector<8x128xf32>
    %35 = arith.addf %32, %34 : vector<8x128xf32>
    %36 = math.tanh %35 : vector<8x128xf32>
    %37 = vector.shape_cast %36 : vector<8x128xf32> to vector<1x8x128xf32>
    %38 = tpu.transpose %37, [0, 2, 1] : vector<1x8x128xf32> -> vector<1x128x8xf32>
    %c0_26 = arith.constant 0 : index
    %c4 = arith.constant 4 : index
    %c0_27 = arith.constant 0 : index
    %39 = vector.load %arg2[%c0_26, %c4, %c0_27] : memref<1x7x256xf32, #tpu.memory_space<vmem>>, vector<1x3x256xf32>
    %c0_28 = arith.constant 0 : index
    %c0_29 = arith.constant 0 : index
    %c0_30 = arith.constant 0 : index
    %40 = vector.load %arg2[%c0_28, %c0_29, %c0_30] : memref<1x7x256xf32, #tpu.memory_space<vmem>>, vector<1x1x256xf32>
    %41 = vector.extract_strided_slice %38 {offsets = [0, 0, 0], sizes = [1, 3, 1], strides = [1, 1, 1]} : vector<1x128x8xf32> to vector<1x3x1xf32>
    %42 = vector.broadcast %41 : vector<1x3x1xf32> to vector<1x3x256xf32>
    %43 = arith.subf %42, %39 : vector<1x3x256xf32>
    %44 = vector.broadcast %40 : vector<1x1x256xf32> to vector<1x3x256xf32>
    %45 = arith.mulf %44, %43 : vector<1x3x256xf32>
    %46 = arith.addf %39, %45 : vector<1x3x256xf32>
    %c0_31 = arith.constant 0 : index
    %c1 = arith.constant 1 : index
    %c0_32 = arith.constant 0 : index
    %47 = vector.load %arg2[%c0_31, %c1, %c0_32] : memref<1x7x256xf32, #tpu.memory_space<vmem>>, vector<1x1x256xf32>
    %48 = vector.extract_strided_slice %38 {offsets = [0, 0, 1], sizes = [1, 3, 1], strides = [1, 1, 1]} : vector<1x128x8xf32> to vector<1x3x1xf32>
    %49 = vector.broadcast %48 : vector<1x3x1xf32> to vector<1x3x256xf32>
    %50 = arith.subf %49, %46 : vector<1x3x256xf32>
    %51 = vector.broadcast %47 : vector<1x1x256xf32> to vector<1x3x256xf32>
    %52 = arith.mulf %51, %50 : vector<1x3x256xf32>
    %53 = arith.addf %46, %52 : vector<1x3x256xf32>
    %c0_33 = arith.constant 0 : index
    %c2 = arith.constant 2 : index
    %c0_34 = arith.constant 0 : index
    %54 = vector.load %arg2[%c0_33, %c2, %c0_34] : memref<1x7x256xf32, #tpu.memory_space<vmem>>, vector<1x1x256xf32>
    %55 = vector.extract_strided_slice %38 {offsets = [0, 0, 2], sizes = [1, 3, 1], strides = [1, 1, 1]} : vector<1x128x8xf32> to vector<1x3x1xf32>
    %56 = vector.broadcast %55 : vector<1x3x1xf32> to vector<1x3x256xf32>
    %57 = arith.subf %56, %53 : vector<1x3x256xf32>
    %58 = vector.broadcast %54 : vector<1x1x256xf32> to vector<1x3x256xf32>
    %59 = arith.mulf %58, %57 : vector<1x3x256xf32>
    %60 = arith.addf %53, %59 : vector<1x3x256xf32>
    %c0_35 = arith.constant 0 : index
    %c3 = arith.constant 3 : index
    %c0_36 = arith.constant 0 : index
    %61 = vector.load %arg2[%c0_35, %c3, %c0_36] : memref<1x7x256xf32, #tpu.memory_space<vmem>>, vector<1x1x256xf32>
    %62 = vector.extract_strided_slice %38 {offsets = [0, 0, 3], sizes = [1, 3, 1], strides = [1, 1, 1]} : vector<1x128x8xf32> to vector<1x3x1xf32>
    %63 = vector.broadcast %62 : vector<1x3x1xf32> to vector<1x3x256xf32>
    %64 = arith.subf %63, %60 : vector<1x3x256xf32>
    %65 = vector.broadcast %61 : vector<1x1x256xf32> to vector<1x3x256xf32>
    %66 = arith.mulf %65, %64 : vector<1x3x256xf32>
    %67 = arith.addf %60, %66 : vector<1x3x256xf32>
    %c0_37 = arith.constant 0 : index
    %c0_38 = arith.constant 0 : index
    %c0_39 = arith.constant 0 : index
    %68 = vector.load %arg11[%c0_37, %c0_38, %c0_39] : memref<1x3x256xf32, #tpu.memory_space<vmem>>, vector<1x3x256xf32>
    tpu.vector_store %arg11[%c0_37, %c0_38, %c0_39], %67 {strides = array<i32>} : memref<1x3x256xf32, #tpu.memory_space<vmem>>, vector<1x3x256xf32>,
    return
  }
  func.func @transform_0(%arg0: i32) -> (i32, i32) {
    %c0_i32 = arith.constant 0 : i32
    %c0_i32_0 = arith.constant 0 : i32
    return %arg0, %c0_i32 : i32, i32
  }
  func.func @transform_1(%arg0: i32) -> (i32, i32, i32) {
    %c0_i32 = arith.constant 0 : i32
    %c0_i32_0 = arith.constant 0 : i32
    %c0_i32_1 = arith.constant 0 : i32
    return %arg0, %c0_i32, %c0_i32_0 : i32, i32, i32
  }
  func.func @transform_2(%arg0: i32) -> (i32, i32) {
    %c0_i32 = arith.constant 0 : i32
    %c0_i32_0 = arith.constant 0 : i32
    %c0_i32_1 = arith.constant 0 : i32
    return %c0_i32, %c0_i32_0 : i32, i32
  }
  func.func @transform_3(%arg0: i32) -> (i32, i32) {
    %c0_i32 = arith.constant 0 : i32
    %c0_i32_0 = arith.constant 0 : i32
    %c0_i32_1 = arith.constant 0 : i32
    return %c0_i32, %c0_i32_0 : i32, i32
  }
  func.func @transform_4(%arg0: i32) -> (i32, i32) {
    %c0_i32 = arith.constant 0 : i32
    %c0_i32_0 = arith.constant 0 : i32
    %c0_i32_1 = arith.constant 0 : i32
    return %c0_i32, %c0_i32_0 : i32, i32
  }
  func.func @transform_5(%arg0: i32) -> (i32, i32) {
    %c0_i32 = arith.constant 0 : i32
    %c0_i32_0 = arith.constant 0 : i32
    %c0_i32_1 = arith.constant 0 : i32
    return %c0_i32, %c0_i32_0 : i32, i32
  }
  func.func @transform_6(%arg0: i32) -> (i32, i32) {
    %c0_i32 = arith.constant 0 : i32
    %c0_i32_0 = arith.constant 0 : i32
    %c0_i32_1 = arith.constant 0 : i32
    return %c0_i32, %c0_i32_0 : i32, i32
  }
  func.func @transform_7(%arg0: i32) -> (i32, i32) {
    %c0_i32 = arith.constant 0 : i32
    %c0_i32_0 = arith.constant 0 : i32
    %c0_i32_1 = arith.constant 0 : i32
    return %c0_i32, %c0_i32_0 : i32, i32
  }
  func.func @transform_8(%arg0: i32) -> (i32, i32) {
    %c0_i32 = arith.constant 0 : i32
    %c0_i32_0 = arith.constant 0 : i32
    %c0_i32_1 = arith.constant 0 : i32
    return %c0_i32, %c0_i32_0 : i32, i32
  }
  func.func @transform_9(%arg0: i32) -> (i32, i32) {
    %c0_i32 = arith.constant 0 : i32
    %c0_i32_0 = arith.constant 0 : i32
    %c0_i32_1 = arith.constant 0 : i32
    return %c0_i32, %c0_i32_0 : i32, i32
  }
  func.func @transform_10(%arg0: i32) -> (i32, i32, i32) {
    %c0_i32 = arith.constant 0 : i32
    %c0_i32_0 = arith.constant 0 : i32
    %c0_i32_1 = arith.constant 0 : i32
    return %arg0, %c0_i32, %c0_i32_0 : i32, i32, i32
  }
}

</mosaic_0001>

<bundles_post_ra>
// kernel: _lambda_.1
= control target key start
LH: loop header
LB: loop body
LE: loop exit
PB: predicated region body
PF: predicated region fallthrough
CT: control target
= control target key end

     0   :  { %s1344_s13 = smov 0   ;;  %s1572_s0 = inlined_call_operand.vmem [shape: f32[16,8], index: 0, kind: input, shape index: {}]   ;;  %s1573_s1 = inlined_call_operand.vmem [shape: f32[2,7,256], index: 1, kind: input, shape index: {}]   ;;  %s1574_s2 = inlined_call_operand.vmem [shape: f32[8,128], index: 2, kind: input, shape index: {}]   ;;  %s1575_s3 = inlined_call_operand.vmem [shape: f32[1,128], index: 3, kind: input, shape index: {}]   ;;  %s1576_s4 = inlined_call_operand.vmem [shape: f32[128,128], index: 4, kind: input, shape index: {}]   ;;  %s1577_s5 = inlined_call_operand.vmem [shape: f32[1,128], index: 5, kind: input, shape index: {}]   ;;  %s1578_s6 = inlined_call_operand.vmem [shape: f32[128,128], index: 6, kind: input, shape index: {}]   ;;  %s1579_s7 = inlined_call_operand.vmem [shape: f32[1,128], index: 7, kind: input, shape index: {}]   ;;  %s1580_s8 = inlined_call_operand.vmem [shape: f32[128,128], index: 8, kind: input, shape index: {}]   ;;  %s1581_s9 = inlined_call_operand.vmem [shape: f32[1,128], index: 9, kind: input, shape index: {}]   ;;  %s1582_s10 = inlined_call_operand.vmem [shape: f32[2,3,256], index: 10, kind: output, shape index: {}]  }
   0x1 LB: > { %s995_s14 = sadd.s32 4294967295, %s1280_s13   ;;  %p999_p0 = scmp.ge.s32.totalorder %s1280_s13, 1  ;;  %s1280_s13 = sphi %s1344_s13, %s20_s13  }
   0x2   : > { %p321_p1 = scmp.lt.s32.totalorder %s1280_s13, 3 }
   0x4   : > { %p322_p2 = pnand %p999_p0, %p321_p1 }
   0x5   : > { %v378_v0 = vld [vmem:[%s1574_s2] sm:$0xff] (!%p322_p2)  ;;  %p363_p3 = scmp.lt.s32.totalorder (!%p322_p2), %s995_s14, 1  ;;  %v1282_v1 = vmov (!%p322_p2), 0.0   ;;  %vm1283_vm0 = vmmov (!%p322_p2), 0   ;;  %v464_v3 = vld [vmem:[%s1576_s4 + $0x8] sm:$0xff] (!%p322_p2)  ;;  %v465_v4 = vld [vmem:[%s1576_s4 + $0x10] sm:$0xff] (!%p322_p2) }
   0x6   : > { %325 = sbr.rel (%p322_p2) target bundleno = 1191 (0x4a7), region = 60  ;;  %1070 = vmatprep.subr.mxu0 (!%p322_p2), %v1282_v1  ;;  %1072 = vmatprep.mubr.msk.f32.mxu0 (!%p322_p2), %vm1283_vm0, %v1282_v1  ;;  %v463_v2 = vld [vmem:[%s1576_s4] sm:$0xff] (!%p322_p2)  ;;  %v1284_v5 = vmov (!%p322_p2), 0.0|0.0   ;;  %v466_v7 = vld [vmem:[%s1576_s4 + $0x18] sm:$0xff] (!%p322_p2)  ;;  %vm386_vm1 = vcmask (!%p322_p2), 64512   ;;  %v468_v10 = vld [vmem:[%s1576_s4 + $0x28] sm:$0xff] (!%p322_p2) }
   0x7   : > { %1071 = vmatpush3.msra.mxu0 (!%p322_p2), %v378_v0  ;;  %1180 = vmatprep.subr.bf16.mxu1 (!%p322_p2), %v1284_v5  ;;  %v1181_v6 = vpack.c.bf16 (!%p322_p2), %v464_v3, %v463_v2  ;;  %v1184_v8 = vpack.c.bf16 (!%p322_p2), %v466_v7, %v465_v4  ;;  %v467_v9 = vld [vmem:[%s1576_s4 + $0x20] sm:$0xff] (!%p322_p2)  ;;  %v469_v13 = vld [vmem:[%s1576_s4 + $0x30] sm:$0xff] (!%p322_p2)  ;;  %v470_v14 = vld [vmem:[%s1576_s4 + $0x38] sm:$0xff] (!%p322_p2) }
   0x8   : > { %1107 = vmatprep.mubr.msk.f32.mxu1 (!%p322_p2), %vm1283_vm0, %v1282_v1  ;;  %1204 = vmatprep.subr.bf16.mxu0 (!%p322_p2), %v1284_v5  ;;  %v1187_v12 = vpack.c.bf16 (!%p322_p2), %v468_v10, %v467_v9  ;;  %v1190_v15 = vpack.c.bf16 (!%p322_p2), %v470_v14, %v469_v13  ;;  %v471_v16 = vld [vmem:[%s1576_s4 + $0x40] sm:$0xff] (!%p322_p2)  ;;  %v472_v17 = vld [vmem:[%s1576_s4 + $0x48] sm:$0xff] (!%p322_p2)  ;;  %v473_v19 = vld [vmem:[%s1576_s4 + $0x50] sm:$0xff] (!%p322_p2) }
   0x9   : > { %1182 = vmatpush3.bf16.msra.mxu1 (!%p322_p2), %v1181_v6  ;;  %v1193_v18 = vpack.c.bf16 (!%p322_p2), %v472_v17, %v471_v16  ;;  %v474_v20 = vld [vmem:[%s1576_s4 + $0x58] sm:$0xff] (!%p322_p2)  ;;  %v475_v22 = vld [vmem:[%s1576_s4 + $0x60] sm:$0xff] (!%p322_p2)  ;;  %v476_v23 = vld [vmem:[%s1576_s4 + $0x68] sm:$0xff] (!%p322_p2) }
   0xa   : > { %1183 = vmatprep.subr.bf16.mxu1 (!%p322_p2), %v1284_v5  ;;  %v1196_v21 = vpack.c.bf16 (!%p322_p2), %v474_v20, %v473_v19  ;;  %v1199_v24 = vpack.c.bf16 (!%p322_p2), %v476_v23, %v475_v22  ;;  %v477_v25 = vld [vmem:[%s1576_s4 + $0x70] sm:$0xff] (!%p322_p2)  ;;  %v478_v26 = vld [vmem:[%s1576_s4 + $0x78] sm:$0xff] (!%p322_p2)  ;;  %v559_v28 = vld [vmem:[%s1578_s6] sm:$0xff] (!%p322_p2) }
   0xb   : > { %v1202_v27 = vpack.c.bf16 (!%p322_p2), %v478_v26, %v477_v25  ;;  %v560_v29 = vld [vmem:[%s1578_s6 + $0x8] sm:$0xff] (!%p322_p2)  ;;  %v561_v30 = vld [vmem:[%s1578_s6 + $0x10] sm:$0xff] (!%p322_p2)  ;;  %v562_v32 = vld [vmem:[%s1578_s6 + $0x18] sm:$0xff] (!%p322_p2) }
   0xc   : > { %v1205_v31 = vpack.c.bf16 (!%p322_p2), %v560_v29, %v559_v28  ;;  %v1208_v33 = vpack.c.bf16 (!%p322_p2), %v562_v32, %v561_v30  ;;  %v563_v34 = vld [vmem:[%s1578_s6 + $0x20] sm:$0xff] (!%p322_p2)  ;;  %v564_v35 = vld [vmem:[%s1578_s6 + $0x28] sm:$0xff] (!%p322_p2)  ;;  %v565_v37 = vld [vmem:[%s1578_s6 + $0x30] sm:$0xff] (!%p322_p2)  ;;  %v1285_v30 = vmov (!%p322_p2), 1  }
   0xd   : > { %s1584_s14 = smov (!%p363_p3, %s995_s14), 1  ;;  %1185 = vmatpush3.bf16.msra.mxu1 %v1184_v8  ;;  %v1211_v36 = vpack.c.bf16 %v564_v35, %v563_v34  ;;  %v566_v38 = vld [vmem:[%s1578_s6 + $0x38] sm:$0xff]  ;;  %v567_v40 = vld [vmem:[%s1578_s6 + $0x40] sm:$0xff]  ;;  %v568_v41 = vld [vmem:[%s1578_s6 + $0x48] sm:$0xff]  ;;  %1268 = vset.pattern.permute.xlu1 %v1285_v30 }
   0xe   : > { %s1000_s25 = sshll.u32 %s1584_s14, 3  ;;  %1186 = vmatprep.subr.bf16.mxu1 %v1284_v5  ;;  %v1214_v39 = vpack.c.bf16 %v566_v38, %v565_v37  ;;  %v1217_v42 = vpack.c.bf16 %v568_v41, %v567_v40  ;;  %v569_v43 = vld [vmem:[%s1578_s6 + $0x50] sm:$0xff]  ;;  %v570_v44 = vld [vmem:[%s1578_s6 + $0x58] sm:$0xff]  ;;  %v571_v46 = vld [vmem:[%s1578_s6 + $0x60] sm:$0xff]  ;;  %v1287_v38 = vmov 2   ;;  %v798_v40 = vlaneseq  ;;  %s1015_s22 = sshll.u32 %s1584_s14, 4 }
   0xf   : > { %s366_s28 = scalar_lea.vmem %s1572_s0, %s1000_s25  ;;  %v1220_v45 = vpack.c.bf16 %v570_v44, %v569_v43  ;;  %v572_v47 = vld [vmem:[%s1578_s6 + $0x68] sm:$0xff]  ;;  %v1005_v49 = vld [vmem:[%s1575_s3] ss:$0 sm:$0xff]  ;;  %v573_v55 = vld [vmem:[%s1578_s6 + $0x70] sm:$0xff]  ;;  %s1556_s26 = scalar_lea.vmem %s1573_s1, %s1015_s22 }
  0x10   : > { %v377_v11 = vld [vmem:[%s366_s28] sm:$0xff]  ;;  %v1223_v48 = vpack.c.bf16 %v572_v47, %v571_v46  ;;  %v574_v56 = vld [vmem:[%s1578_s6 + $0x78] sm:$0xff]  ;;  %v656_v59 = vld [vmem:[%s1580_s8 + $0x8] sm:$0xff]  ;;  %v799_v41 = vshrl.u32 %v798_v40, 7  ;;  %s376_s29 = scalar_lea.vmem %s1582_s10, %s1000_s25 }
  0x11   : > { %1073 = vmatmul.mubr.msk.f32.vlgmr.msra.gmra.mrb[0].mxu0 %vm386_vm1, %v377_v11  ;;  %1188 = vmatpush3.bf16.msra.mxu1 %v1187_v12  ;;  %v1226_v57 = vpack.c.bf16 %v574_v56, %v573_v55  ;;  %v655_v58 = vld [vmem:[%s1580_s8] sm:$0xff]  ;;  %v657_v60 = vld [vmem:[%s1580_s8 + $0x10] sm:$0xff]  ;;  %v658_v62 = vld [vmem:[%s1580_s8 + $0x18] sm:$0xff] }
  0x12   : > { %1142 = vmatprep.mubr.msk.f32.mxu0 %vm1283_vm0, %v1282_v1  ;;  %1189 = vmatprep.subr.bf16.mxu1 %v1284_v5  ;;  %v1229_v61 = vpack.c.bf16 %v656_v59, %v655_v58  ;;  %v1232_v63 = vpack.c.bf16 %v658_v62, %v657_v60  ;;  %v659_v0 = vld [vmem:[%s1580_s8 + $0x20] sm:$0xff]  ;;  %v661_v3 = vld [vmem:[%s1580_s8 + $0x30] sm:$0xff]  ;;  %v662_v4 = vld [vmem:[%s1580_s8 + $0x38] sm:$0xff]  ;;  %v800_v44 = vsub.s32 0, %v799_v41 }
  0x13   : > { %1206 = vmatpush3.bf16.msra.mxu0 %v1205_v31  ;;  %v1238_v6 = vpack.c.bf16 %v662_v4, %v661_v3  ;;  %v663_v7 = vld [vmem:[%s1580_s8 + $0x40] sm:$0xff]  ;;  %v664_v8 = vld [vmem:[%s1580_s8 + $0x48] sm:$0xff]  ;;  %v665_v10 = vld [vmem:[%s1580_s8 + $0x50] sm:$0xff] }
  0x14   : > { %1207 = vmatprep.subr.bf16.mxu0 %v1284_v5  ;;  %v1241_v9 = vpack.c.bf16 %v664_v8, %v663_v7  ;;  %v666_v11 = vld [vmem:[%s1580_s8 + $0x58] sm:$0xff]  ;;  %v667_v13 = vld [vmem:[%s1580_s8 + $0x60] sm:$0xff]  ;;  %v668_v14 = vld [vmem:[%s1580_s8 + $0x68] sm:$0xff] }
  0x15   : > { %1191 = vmatpush3.bf16.msra.mxu1 %v1190_v15  ;;  %v1244_v12 = vpack.c.bf16 %v666_v11, %v665_v10  ;;  %v1247_v15 = vpack.c.bf16 %v668_v14, %v667_v13  ;;  %v1007_v16 = vld [vmem:[%s1577_s5] ss:$0 sm:$0xff]  ;;  %v669_v22 = vld [vmem:[%s1580_s8 + $0x70] sm:$0xff]  ;;  %v670_v23 = vld [vmem:[%s1580_s8 + $0x78] sm:$0xff] }
  0x16   : > { %1192 = vmatprep.subr.bf16.mxu1 %v1284_v5  ;;  %v1009_v31 = vld [vmem:[%s1581_s9] ss:$0 sm:$0xff]  ;;  %v782_v43 = vld [vmem:[%s1556_s26 + $0x8] sm:$0x70] }
  0x17   : > { %1209 = vmatpush3.bf16.msra.mxu0 %v1208_v33  ;;  %v783_v46 = vld [vmem:[%s1556_s26] ss:$8 sm:$0x3]  ;;  %v1010_v58 = vld [vmem:[%s1556_s26 + $0x1] ss:$8 sm:$0x3] }
  0x18   : > { %1210 = vmatprep.subr.bf16.mxu0 %v1284_v5 }
  0x19   : > { %1194 = vmatpush3.bf16.msra.mxu1 %v1193_v18 }
  0x1a   : > { %1195 = vmatprep.subr.bf16.mxu1 %v1284_v5 }
  0x1b   : > { %1212 = vmatpush3.bf16.msra.mxu0 %v1211_v36  ;;  %v1286_v36 = vmov 0  }
  0x1c   : > { %1213 = vmatprep.subr.bf16.mxu0 %v1284_v5 }
  0x1d   : > { %1197 = vmatpush3.bf16.msra.mxu1 %v1196_v21 }
  0x1e   : > { %1198 = vmatprep.subr.bf16.mxu1 %v1284_v5 }
  0x1f   : > { %1215 = vmatpush3.bf16.msra.mxu0 %v1214_v39  ;;  %v1288_v39 = vmov 3  }
  0x20   : > { %1216 = vmatprep.subr.bf16.mxu0 %v1284_v5 }
  0x21   : > { %1200 = vmatpush3.bf16.msra.mxu1 %v1199_v24  ;;  %v1008_v24 = vld [vmem:[%s1579_s7] ss:$0 sm:$0xff] }
  0x22   : > { %1201 = vmatprep.subr.bf16.mxu1 %v1284_v5 }
  0x23   : > { %1218 = vmatpush3.bf16.msra.mxu0 %v1217_v42  ;;  %v781_v42 = vld [vmem:[%s1556_s26] sm:$0x70] }
  0x24   : > { %1219 = vmatprep.subr.bf16.mxu0 %v1284_v5  ;;  %v791_v47 = vrot.slane %v781_v42, 4 }
  0x25   : > { %1203 = vmatpush3.bf16.msra.mxu1 %v1202_v27 }
  0x26   : > { %1228 = vmatprep.subr.bf16.mxu1 %v1284_v5 }
  0x27   : > { %1221 = vmatpush3.bf16.msra.mxu0 %v1220_v45  ;;  %v804_v45 = vsub.s32 1, %v799_v41 }
  0x28   : > { %1222 = vmatprep.subr.bf16.mxu0 %v1284_v5 }
  0x2b   : > { %1224 = vmatpush3.bf16.msra.mxu0 %v1223_v48  ;;  %v792_v48 = vrot.slane %v782_v43, 4 }
  0x2c   : > { %1225 = vmatprep.subr.bf16.mxu0 %v1284_v5 }
  0x2f   : > { %1227 = vmatpush3.bf16.msra.mxu0 %v1226_v57 }
  0xe4   : > { %v456_v50 = vpop.f32.mrb[0].mxu0 }
  0xe5   : > { %v457_v51 = vadd.f32 %v1005_v49, %v456_v50  ;;  %v1074_v52 = vpop.f32.mrb[1].mxu0  ;;  %v801_v49 = vrot.slane %v783_v46, %v800_v44  ;;  %v805_v50 = vrot.slane %v783_v46, %v804_v45 }
  0xe7   : > { %v461_v53 = vmul.f32 0.2, %v457_v51  ;;  %vm460_vm2 = vcmp.gt.f32.partialorder %v457_v51, 0.0 }
  0xe9   : > { %v462_v54 = vsel %vm460_vm2, %v457_v51, %v461_v53 }
  0xea   : > { %1108 = vmatmul.mubr.f32.vlgmr.msra.gmra.mrb[0].mxu1 %v462_v54 }
  0xeb   : > { %1177 = vmatprep.mubr.msk.f32.mxu1 %vm1283_vm0, %v1282_v1  ;;  %1230 = vmatpush3.bf16.msra.mxu1 %v1229_v61  ;;  %v660_v1 = vld [vmem:[%s1580_s8 + $0x28] sm:$0xff] }
  0xec   : > { %1231 = vmatprep.subr.bf16.mxu1 %v1284_v5  ;;  %v1235_v2 = vpack.c.bf16 %v660_v1, %v659_v0  ;;  %v840_v0 = vrot.slane %v1010_v58, %v804_v45 }
  0xef   : > { %1233 = vmatpush3.bf16.msra.mxu1 %v1232_v63  ;;  %v836_v63 = vrot.slane %v1010_v58, %v800_v44 }
  0xf0   : > { %1234 = vmatprep.subr.bf16.mxu1 %v1284_v5 }
  0xf3   : > { %1236 = vmatpush3.bf16.msra.mxu1 %v1235_v2 }
  0xf4   : > { %1237 = vmatprep.subr.bf16.mxu1 %v1284_v5 }
  0xf7   : > { %1239 = vmatpush3.bf16.msra.mxu1 %v1238_v6 }
  0xf8   : > { %1240 = vmatprep.subr.bf16.mxu1 %v1284_v5 }
  0xfb   : > { %1242 = vmatpush3.bf16.msra.mxu1 %v1241_v9  ;;  %v1011_v9 = vld [vmem:[%s1556_s26 + $0x2] ss:$8 sm:$0x3] }
  0xfc   : > { %1243 = vmatprep.subr.bf16.mxu1 %v1284_v5  ;;  %v875_v13 = vrot.slane %v1011_v9, %v804_v45 }
  0xff   : > { %1245 = vmatpush3.bf16.msra.mxu1 %v1244_v12  ;;  %v871_v12 = vrot.slane %v1011_v9, %v800_v44 }
 0x100   : > { %1246 = vmatprep.subr.bf16.mxu1 %v1284_v5 }
 0x103   : > { %1248 = vmatpush3.bf16.msra.mxu1 %v1247_v15 }
 0x104   : > { %1249 = vmatprep.subr.bf16.mxu1 %v1284_v5  ;;  %v1250_v5 = vpack.c.bf16 %v670_v23, %v669_v22  ;;  %v1012_v23 = vld [vmem:[%s1556_s26 + $0x3] ss:$8 sm:$0x3] }
 0x107   : > { %1251 = vmatpush3.bf16.msra.mxu1 %v1250_v5 }
 0x1bd   : > { %v552_v17 = vpop.f32.mrb[0].mxu1 }
 0x1be   : > { %v553_v18 = vadd.f32 %v1007_v16, %v552_v17  ;;  %v1109_v19 = vpop.f32.mrb[1].mxu1 }
 0x1c0   : > { %vm556_vm3 = vcmp.gt.f32.partialorder %v553_v18, 0.0  ;;  %v557_v20 = vmul.f32 0.2, %v553_v18 }
 0x1c2   : > { %v558_v21 = vsel %vm556_vm3, %v553_v18, %v557_v20 }
 0x1c3   : > { %1143 = vmatmul.mubr.f32.vlgmr.msra.gmra.mrb[2].mxu0 %v558_v21 }
 0x296   : > { %v648_v25 = vpop.f32.mrb[2].mxu0 }
 0x297   : > { %v649_v26 = vadd.f32 %v1008_v24, %v648_v25  ;;  %v1144_v27 = vpop.f32.mrb[3].mxu0  ;;  %v906_v25 = vrot.slane %v1012_v23, %v800_v44 }
 0x299   : > { %vm652_vm4 = vcmp.gt.f32.partialorder %v649_v26, 0.0  ;;  %v653_v28 = vmul.f32 0.2, %v649_v26 }
 0x29b   : > { %v654_v29 = vsel %vm652_vm4, %v649_v26, %v653_v28  ;;  %v910_v26 = vrot.slane %v1012_v23, %v804_v45 }
 0x29c   : > { %1178 = vmatmul.mubr.f32.vlgmr.msra.gmra.mrb[2].mxu1 %v654_v29 }
 0x36f   : > { %v744_v32 = vpop.f32.mrb[2].mxu1 }
 0x370   : > { %v745_v33 = vadd.f32 %v1009_v31, %v744_v32  ;;  %v1179_v34 = vpop.f32.mrb[3].mxu1 }
 0x372   : > { %1272 = vtanh.f32 %v745_v33 }
 0x37c   : > { %v1273_v35 = vpop.eup %1272 }
 0x37d   : > { %749 = vxpose.xlu0.b32.start.end [1/1] (short) (narrow) %v1273_v35, 8 }
 0x3a6   : > { %1267 = vset.pattern.permute.xlu0 %v1286_v36 }
 0x3fd   : > { %v765_v37 = vpop.trf.xlu0 }
 0x3fe   : > { %821 = vperm.xlu1 %1268, %v765_v37   ;;  %786 = vperm.xlu0 %1267, %v765_v37  }
 0x402   : > { %1269 = vset.pattern.permute.xlu1 %v1287_v38  ;;  %1271 = vset.pattern.permute.xlu0 %v1288_v39 }
 0x403   : > { %856 = vperm.xlu1 %1269, %v765_v37  }
 0x407   : > { %1270 = vset.pattern.permute.xlu1 %v1288_v39 }
 0x408   : > { %891 = vperm.xlu1 %1270, %v765_v37  }
 0x47d   : > { %v787_v51 = vpop.permute.xlu0 %786  ;;  %v822_v1 = vpop.permute.xlu1 %821 }
 0x47e   : > { %v795_v52 = vsub.f32 %v787_v51, %v791_v47  ;;  %v796_v53 = vsub.f32 %v787_v51, %v792_v48 }
 0x480   : > { %v808_v54 = vmul.f32 %v801_v49, %v795_v52  ;;  %v809_v55 = vmul.f32 %v805_v50, %v796_v53 }
 0x482   : > { %v812_v56 = vrot.slane %v808_v54, 4  ;;  %v813_v57 = vrot.slane %v809_v55, 4  ;;  %v857_v16 = vpop.permute.xlu1 %856 }
 0x484   : > { %v816_v59 = vadd.f32 %v812_v56, %v781_v42  ;;  %v817_v60 = vadd.f32 %v813_v57, %v782_v43 }
 0x486   : > { %v826_v61 = vrot.slane %v816_v59, 4  ;;  %v827_v62 = vrot.slane %v817_v60, 4 }
 0x487   : > { %v892_v29 = vpop.permute.xlu1 %891 }
 0x488   : > { %v830_v2 = vsub.f32 %v822_v1, %v826_v61  ;;  %v831_v3 = vsub.f32 %v822_v1, %v827_v62 }
 0x48a   : > { %v843_v4 = vmul.f32 %v836_v63, %v830_v2  ;;  %v844_v6 = vmul.f32 %v840_v0, %v831_v3 }
 0x48c   : > { %v847_v7 = vrot.slane %v843_v4, 4  ;;  %v848_v8 = vrot.slane %v844_v6, 4 }
 0x48e   : > { %v851_v10 = vadd.f32 %v847_v7, %v816_v59  ;;  %v852_v11 = vadd.f32 %v848_v8, %v817_v60 }
 0x490   : > { %v861_v14 = vrot.slane %v851_v10, 4  ;;  %v862_v15 = vrot.slane %v852_v11, 4 }
 0x492   : > { %v865_v17 = vsub.f32 %v857_v16, %v861_v14  ;;  %v866_v18 = vsub.f32 %v857_v16, %v862_v15 }
 0x494   : > { %v878_v19 = vmul.f32 %v871_v12, %v865_v17  ;;  %v879_v20 = vmul.f32 %v875_v13, %v866_v18 }
 0x496   : > { %v882_v21 = vrot.slane %v878_v19, 4  ;;  %v883_v22 = vrot.slane %v879_v20, 4 }
 0x498   : > { %v886_v5 = vadd.f32 %v882_v21, %v851_v10  ;;  %v887_v24 = vadd.f32 %v883_v22, %v852_v11 }
 0x49a   : > { %v896_v27 = vrot.slane %v886_v5, 4  ;;  %v897_v28 = vrot.slane %v887_v24, 4 }
 0x49c   : > { %v900_v30 = vsub.f32 %v892_v29, %v896_v27  ;;  %v901_v31 = vsub.f32 %v892_v29, %v897_v28 }
 0x49e   : > { %v913_v32 = vmul.f32 %v906_v25, %v900_v30  ;;  %v914_v33 = vmul.f32 %v910_v26, %v901_v31 }
 0x4a0   : > { %v917_v34 = vrot.slane %v913_v32, 4  ;;  %v918_v35 = vrot.slane %v914_v33, 4 }
 0x4a2   : > { %v921_v36 = vadd.f32 %v917_v34, %v886_v5  ;;  %v922_v37 = vadd.f32 %v918_v35, %v887_v24 }
 0x4a4   : > { %v925_v38 = vcombine.high %v921_v36, %v922_v37 }
 0x4a6   : > { %927 = vst [vmem:[%s376_s29] sm:$0x77] %v925_v38 }
 0x4a7 PF: > { %s20_s13 = sadd.s32 1, %s1280_s13  }
 0x4a8   : > { %p17_p4 = scmp.ge.s32.totalorder %s20_s13, 4  }
 0x4aa   :  { %19 = sbr.rel (!%p17_p4) target bundleno = 1 (0x1), region = 96 }

</bundles_post_ra>
